<compile_context>
chip_gen: v7x
topology: tpu7x:2x2x1
jax: 0.10.0
libtpu: 0.0.40
codegen_flags: <defaults>
</compile_context>

<pallas_src>
import jax
import jax.numpy as jnp
import numpy as np
from jax.experimental import pallas as pl
from jax.experimental.pallas import tpu as pltpu


# ---------------------------------------------------------------------------
# Parameter construction (plain JAX glue — mirrors the PyTorch __init__)
# ---------------------------------------------------------------------------
def sample_skew_symmetric_matrix(key, dim: int) -> jnp.ndarray:
    """Random skew-symmetric matrix with uniform upper-triangular entries."""
    num_params = (dim - 1) * dim // 2
    params = jax.random.uniform(key, (num_params,), dtype=jnp.float32)
    iu = np.triu_indices(dim, k=1)  # row-major order == PyTorch loop order
    mat = jnp.zeros((dim, dim), dtype=jnp.float32)
    mat = mat.at[iu].set(params)
    return mat - mat.T


def sample_orthogonal_matrix(key, dim: int) -> jnp.ndarray:
    return jax.scipy.linalg.expm(sample_skew_symmetric_matrix(key, dim))


def init_stiefel_params(key, dim_in: int, dim_out: int) -> jnp.ndarray:
    """Returns flattened Stiefel point of shape [1, dim_out * dim_in]."""
    mat = sample_orthogonal_matrix(key, dim_out)[:, 0:dim_in]
    return mat.reshape(1, -1)


def _round_up(x: int, m: int) -> int:
    return (x + m - 1) // m * m


# ---------------------------------------------------------------------------
# Kernels
# ---------------------------------------------------------------------------
def _stiefel_small_kernel(x_ref, w_ref, b_ref, o_ref):
    # Whole problem in one full-extent block: single MXU matmul + bias.
    o_ref[...] = (
        jnp.dot(x_ref[...], w_ref[...], preferred_element_type=jnp.float32)
        + b_ref[...]
    ).astype(o_ref.dtype)


def _stiefel_tiled_kernel_f32(x_ref, w_ref, b_ref, o_ref):
    # f32 output: accumulate directly into the resident output block.
    k = pl.program_id(2)

    @pl.when(k == 0)
    def _init():
        o_ref[...] = jnp.broadcast_to(b_ref[...], o_ref.shape)

    o_ref[...] += jnp.dot(x_ref[...], w_ref[...],
                          preferred_element_type=jnp.float32)


def _stiefel_tiled_kernel_acc(x_ref, w_ref, b_ref, o_ref, acc_ref):
    # Non-f32 output: keep an f32 VMEM accumulator, cast once at the end.
    k = pl.program_id(2)

    @pl.when(k == 0)
    def _init():
        acc_ref[...] = jnp.broadcast_to(b_ref[...], acc_ref.shape)

    acc_ref[...] += jnp.dot(x_ref[...], w_ref[...],
                            preferred_element_type=jnp.float32)

    @pl.when(k == pl.num_programs(2) - 1)
    def _finalize():
        o_ref[...] = acc_ref[...].astype(o_ref.dtype)


# ---------------------------------------------------------------------------
# One-time parameter preparation (hoisted out of the per-call forward)
# ---------------------------------------------------------------------------
def prepare_stiefel_params(params_flat, bias, dim_in, dim_out,
                           tn: int = 512, tk: int = 1024,
                           weight_dtype=jnp.float32):
    """Transpose + pad W and bias once; pick N/K tile sizes once."""
    w_t = params_flat.reshape(dim_out, dim_in).T          # [K, N] natural MXU RHS
    b_row = bias.reshape(1, dim_out).astype(jnp.float32)

    tn = min(tn, _round_up(dim_out, 128))
    tk = min(tk, _round_up(dim_in, 128))

    # v7x megacore heuristic: keep >= 2 blocks along N when dim_out permits, so
    # both TensorCores have work even if the batch fits a single M tile.
    n_pad128 = _round_up(dim_out, 128)
    if n_pad128 >= 256 and n_pad128 // tn < 2:
        tn = _round_up(n_pad128 // 2, 128)

    N = _round_up(dim_out, tn)
    K = _round_up(dim_in, tk)

    w_p = jnp.pad(w_t, ((0, K - dim_in), (0, N - dim_out))).astype(weight_dtype)
    b_p = jnp.pad(bias, (0, N - dim_out)).reshape(1, N).astype(jnp.float32)

    # "Small" = whole problem fits comfortably in VMEM as one block.
    small = (dim_in <= 512) and (dim_out <= 512)

    return dict(dim_in=dim_in, dim_out=dim_out,
                w_t=w_t, b_row=b_row, w_p=w_p, b_p=b_p,
                tn=tn, tk=tk, N=N, K=K, small=small)


# ---------------------------------------------------------------------------
# Forward
# ---------------------------------------------------------------------------
def stiefel_layer_forward(x, prep, tm: int = 512, force_tiled: bool = False):
    """x: [B, dim_in] -> [B, dim_out]."""
    B = x.shape[0]
    dim_in, dim_out = prep["dim_in"], prep["dim_out"]
    assert x.shape[1] == dim_in

    # ---- small-shape fast path: one full-extent block, no pad / grid ----
    if prep["small"] and B <= 1024 and not force_tiled:
        return pl.pallas_call(
            _stiefel_small_kernel,
            out_shape=jax.ShapeDtypeStruct((B, dim_out), x.dtype),
        )(x, prep["w_t"], prep["b_row"])

    # ---- tiled path ----
    tn, tk, N, K = prep["tn"], prep["tk"], prep["N"], prep["K"]
    w_p, b_p = prep["w_p"], prep["b_p"]

    tm = min(tm, _round_up(B, 8))
    M = _round_up(B, tm)

    x_p = x
    if (M, K) != (B, dim_in):
        x_p = jnp.pad(x, ((0, M - B), (0, K - dim_in)))
    if w_p.dtype != x_p.dtype:            # optional bf16 storage path
        x_p = x_p.astype(w_p.dtype)

    grid = (M // tm, N // tn, K // tk)

    out_is_f32 = x.dtype == jnp.float32
    kernel = _stiefel_tiled_kernel_f32 if out_is_f32 else _stiefel_tiled_kernel_acc
    scratch = [] if out_is_f32 else [pltpu.VMEM((tm, tn), jnp.float32)]

    # VMEM budget: double-buffered x/W streams + output buffers (+acc) + bias.
    in_item = jnp.dtype(w_p.dtype).itemsize
    vmem_bytes = (2 * (tm * tk + tk * tn) * in_item
                  + 2 * tm * tn * 4
                  + (0 if out_is_f32 else tm * tn * 4)
                  + 2 * tn * 4)
    vmem_limit = max(int(vmem_bytes * 1.5) + (1 << 20), 32 << 20)
    vmem_limit = min(vmem_limit, 64 << 20)   # stay legal on v7x (64 MiB physical)

    # Account for operand re-streaming across the grid.
    cost = pl.CostEstimate(
        flops=2 * M * N * K,
        transcendentals=0,
        bytes_accessed=in_item * ((N // tn) * M * K + (M // tm) * K * N)
                       + 4 * (M * N + N),
    )

    out = pl.pallas_call(
        kernel,
        out_shape=jax.ShapeDtypeStruct((M, N), x.dtype),
        grid_spec=pltpu.PrefetchScalarGridSpec(
            num_scalar_prefetch=0,
            grid=grid,
            in_specs=[
                pl.BlockSpec((tm, tk), lambda i, j, k: (i, k)),   # x tile
                pl.BlockSpec((tk, tn), lambda i, j, k: (k, j)),   # W^T tile
                pl.BlockSpec((1, tn), lambda i, j, k: (0, j)),    # bias tile
            ],
            out_specs=pl.BlockSpec((tm, tn), lambda i, j, k: (i, j)),
            scratch_shapes=scratch,
        ),
        compiler_params=pltpu.CompilerParams(
            dimension_semantics=("parallel", "parallel", "arbitrary"),
            vmem_limit_bytes=vmem_limit,
        ),
        cost_estimate=cost,
    )(x_p, w_p, b_p)

    if (M, N) != (B, dim_out):
        out = out[:B, :dim_out]
    return out


# ---------------------------------------------------------------------------
# Reference (pure JAX) for correctness check
# ---------------------------------------------------------------------------
def reference_forward(x, params_flat, bias, dim_in, dim_out):
    w = params_flat.reshape(dim_out, dim_in)
    return x @ w.T + bias[None, :]


if __name__ == "__main__":
    # TODO(synk): StiefelConstraint / ConstrainedParameter projection machinery
    # is training-time infrastructure, not part of forward; only the forward
    # (linear + bias with Stiefel-initialized W) is implemented as a kernel.
    dim_in = 32
    dim_out = 64   # StiefelConstraint requires dim_out >= dim_in
    batch = 8

    key = jax.random.PRNGKey(0)
    k_params, k_bias, k_x = jax.random.split(key, 3)

    params_flat = init_stiefel_params(k_params, dim_in, dim_out)       # [1, dim_out*dim_in]
    bias = jax.random.uniform(k_bias, (dim_out,), dtype=jnp.float32)   # torch.rand(dim_out)
    x = jax.random.normal(k_x, (batch, dim_in), dtype=jnp.float32)

    prep = prepare_stiefel_params(params_flat, bias, dim_in, dim_out)
    y_ref = reference_forward(x, params_flat, bias, dim_in, dim_out)

    # Fast path (single full-extent block, no padding).
    y_fast = jax.block_until_ready(stiefel_layer_forward(x, prep))
    np.testing.assert_allclose(np.asarray(y_fast), np.asarray(y_ref),
                               rtol=1e-5, atol=1e-5)

    # Tiled path (padding, 3-axis grid, K-accumulation into resident output).
    y_tiled = jax.block_until_ready(stiefel_layer_forward(x, prep, force_tiled=True))
    np.testing.assert_allclose(np.asarray(y_tiled), np.asarray(y_ref),
                               rtol=1e-5, atol=1e-5)

    print("KERNEL_OK")
</pallas_src>

<mosaic_0001>
module attributes {stable_mosaic.version = 11 : i64} {
  func.func @_stiefel_small_kernel(%arg0: memref<8x32xf32, #tpu.memory_space<vmem>>, %arg1: memref<32x64xf32, #tpu.memory_space<vmem>>, %arg2: memref<1x64xf32, #tpu.memory_space<vmem>>, %arg3: memref<8x64xf32, #tpu.memory_space<vmem>>) attributes {dimension_semantics = [], scalar_prefetch = 0 : i64, scratch_operands = 0 : i64, tpu.core_type = #tpu.core_type<tc>} {
    %c0 = arith.constant 0 : index
    %c0_0 = arith.constant 0 : index
    %0 = vector.load %arg0[%c0, %c0_0] : memref<8x32xf32, #tpu.memory_space<vmem>>, vector<8x32xf32>
    %c0_1 = arith.constant 0 : index
    %c0_2 = arith.constant 0 : index
    %1 = vector.load %arg1[%c0_1, %c0_2] : memref<32x64xf32, #tpu.memory_space<vmem>>, vector<32x64xf32>
    %cst = arith.constant dense<0.000000e+00> : vector<8x64xf32>
    %2 = tpu.matmul %0, %1, %cst {dimension_numbers = #tpu.dot_dimension_numbers<[1], [0], [0], [1], [0, 0, 1, 1], [], []>} : vector<8x32xf32>, vector<32x64xf32>, vector<8x64xf32> -> vector<8x64xf32>
    %c0_3 = arith.constant 0 : index
    %c0_4 = arith.constant 0 : index
    %3 = vector.load %arg2[%c0_3, %c0_4] : memref<1x64xf32, #tpu.memory_space<vmem>>, vector<1x64xf32>
    %4 = vector.broadcast %3 : vector<1x64xf32> to vector<8x64xf32>
    %5 = arith.addf %2, %4 : vector<8x64xf32>
    %c0_5 = arith.constant 0 : index
    %c0_6 = arith.constant 0 : index
    %6 = vector.load %arg3[%c0_5, %c0_6] : memref<8x64xf32, #tpu.memory_space<vmem>>, vector<8x64xf32>
    tpu.vector_store %arg3[%c0_5, %c0_6], %5 {strides = array<i32>} : memref<8x64xf32, #tpu.memory_space<vmem>>, vector<8x64xf32>,
    return
  }
}

</mosaic_0001>

<bundles_post_ra>
// kernel: tpu_custom_call.1
= control target key start
LH: loop header
LB: loop body
LE: loop exit
PB: predicated region body
PF: predicated region fallthrough
CT: control target
= control target key end

     0   :  { %8 = vsyncpa [#allocation3], 0  ;;  %s323_s0 = inlined_call_operand.hbm [shape: f32[8,32], index: 0, kind: input, shape index: {}]   ;;  %s324_s1 = inlined_call_operand.hbm [shape: f32[32,64], index: 1, kind: input, shape index: {}]   ;;  %s325_s2 = inlined_call_operand.vmem [shape: f32[1,64], index: 2, kind: input, shape index: {}]   ;;  %s326_s3 = inlined_call_operand.hbm [shape: f32[8,64], index: 3, kind: output, shape index: {}]  }
   0x1   :  { %9 = vsyncpa [#allocation6], 0 }
   0x2   :  { %10 = vsyncpa [#allocation4], 0  ;;  %s249_s12 = smov [#allocation2]   ;;  %s250_s14 = smov [#allocation5]  }
   0x3   :  { %s17_s13 = sshll.u32 %s249_s12, 4  ;;  %s26_s15 = sshll.u32 %s250_s14, 4  ;;  %s18_s13 = int_to_ptr.vmem [resolvable:$true] %s17_s13  ;;  %s277_s15 = int_to_ptr.vmem [resolvable:$true] %s26_s15 }
   0x4   :  { %s177_s18 = scalar_lea.hbm %s323_s0, 128 }
   0x5   :  { %p178_p0 = scmp.ne.s32.totalorder %s323_s0, %s177_s18  ;;  %p181_p1 = scmp.lt.u32.totalorder %s177_s18, %s323_s0 }
   0x7   :  { %p183_p2 = pnand %p181_p1, %p178_p0 }
   0x9   :  { %186 = shalt.err (!%p183_p2)
}
   0xa   :  { %s187_s23 = scalar_lea.vmem %s18_s13, 128  ;;  %p192_p4 = scmp.lt.s32.totalorder %s18_s13, %s18_s13 }
   0xb   :  { %p188_p3 = scmp.ne.s32.totalorder %s18_s13, %s187_s23  ;;  %p193_p5 = scmp.lt.s32.totalorder %s187_s23, %s187_s23 }
   0xd   :  { %p194_p6 = por %p193_p5, %p192_p4 }
   0xf   :  { %p195_p7 = pnand %p194_p6, %p188_p3 }
  0x11   :  { %198 = shalt.err (!%p195_p7)
}
  0x12   :  { %20 = dma.hbm_to_vmem [thread:$0]  %s323_s0, 128, %s18_s13, [#allocation3]  }
  0x13   :  { %s199_s28 = scalar_lea.hbm %s324_s1, 512 }
  0x14   :  { %p200_p8 = scmp.ne.s32.totalorder %s324_s1, %s199_s28  ;;  %p203_p9 = scmp.lt.u32.totalorder %s199_s28, %s324_s1 }
  0x16   :  { %p205_p10 = pnand %p203_p9, %p200_p8 }
  0x18   :  { %208 = shalt.err (!%p205_p10)
}
  0x19   :  { %s209_s6 = scalar_lea.vmem %s277_s15, 512  ;;  %p214_p12 = scmp.lt.s32.totalorder %s277_s15, %s277_s15 }
  0x1a   :  { %p210_p11 = scmp.ne.s32.totalorder %s277_s15, %s209_s6  ;;  %p215_p13 = scmp.lt.s32.totalorder %s209_s6, %s209_s6 }
  0x1c   :  { %p216_p0 = por %p215_p13, %p214_p12 }
  0x1e   :  { %p217_p1 = pnand %p216_p0, %p210_p11 }
  0x20   :  { %220 = shalt.err (!%p217_p1)
}
  0x21   :  { %s251_s0 = smov 128   ;;  %s252_s7 = smov 8  }
  0x22   :  { %32 = dma.hbm_to_vmem [thread:$0]  %s324_s1, 512, %s277_s15, [#allocation6], %s251_s0, %s251_s0, %s252_s7  }
  0x23   :  { %243 = dma.done.wait [#allocation3], 128  }
  0x24   :  { %244 = vsyncadd [#allocation3], 4294967168 }
  0x25   :  { %245 = dma.done.wait [#allocation6], 512  }
  0x26   :  { %246 = vsyncadd [#allocation6], 4294966784  ;;  %v253_v0 = vmov 0.0|0.0   ;;  %vm254_vm0 = vmmov 0   ;;  %v255_v1 = vmov 0.0   ;;  %v42_v2 = vld [vmem:[#allocation5] sm:$0xff] }
  0x27   :  { %163 = vmatprep.subr.bf16.mxu0 %v253_v0  ;;  %160 = vmatprep.mubr.msk.f32.mxu0 %vm254_vm0, %v255_v1  ;;  %v43_v3 = vld [vmem:[#allocation5 + $0x8] sm:$0xff]  ;;  %v44_v4 = vld [vmem:[#allocation5 + $0x10] sm:$0xff]  ;;  %v45_v6 = vld [vmem:[#allocation5 + $0x18] sm:$0xff]  ;;  %vm53_vm1 = vcmask 261120   ;;  %s256_s11 = smov [#allocation7]   ;;  %vm127_vm2 = vcmask 523264  }
  0x28   :  { %v164_v5 = vpack.c.bf16 %v43_v3, %v42_v2  ;;  %v167_v7 = vpack.c.bf16 %v45_v6, %v44_v4  ;;  %v41_v8 = vld [vmem:[#allocation2] sm:$0xff]  ;;  %s135_s12 = sshll.u32 %s256_s11, 4  ;;  %s136_s12 = int_to_ptr.vmem [resolvable:$true] %s135_s12 }
  0x29   :  { %v145_v9 = vld [vmem:[%s325_s2] ss:$0 sm:$0xff]  ;;  %s221_s13 = scalar_lea.vmem %s136_s12, 128  ;;  %p226_p3 = scmp.lt.s32.totalorder %s136_s12, %s136_s12 }
  0x2a   :  { %165 = vmatpush3.bf16.msra.mxu0 %v164_v5  ;;  %p222_p2 = scmp.ne.s32.totalorder %s136_s12, %s221_s13  ;;  %p227_p4 = scmp.lt.s32.totalorder %s221_s13, %s221_s13 }
  0x2b   :  { %166 = vmatprep.subr.bf16.mxu0 %v253_v0 }
  0x2c   :  { %p228_p5 = por %p227_p4, %p226_p3 }
  0x2e   :  { %168 = vmatpush3.bf16.msra.mxu0 %v167_v7  ;;  %p229_p6 = pnand %p228_p5, %p222_p2 }
  0x31   :  { %161 = vmatmul.mubr.msk.f32.vlgmr.msra.gmra.mrb[0].mxu0 %vm53_vm1, %v41_v8 }
 0x104   :  { %v123_v10 = vpop.f32.mrb[0].mxu0 }
 0x105   :  { %v124_v11 = vadd.f32 %v145_v9, %v123_v10  ;;  %v162_v12 = vpop.f32.mrb[1].mxu0 }
 0x107   :  { %128 = vst.msk [vmem:[#allocation7] sm:$0xff] %vm127_vm2, %v124_v11 }
 0x108   :  { %232 = shalt.err (!%p229_p6)
}
 0x109   :  { %s233_s16 = scalar_lea.hbm %s326_s3, 128 }
 0x10a   :  { %p234_p7 = scmp.ne.s32.totalorder %s326_s3, %s233_s16  ;;  %p237_p8 = scmp.lt.u32.totalorder %s233_s16, %s326_s3 }
 0x10c   :  { %p239_p9 = pnand %p237_p8, %p234_p7 }
 0x10e   :  { %242 = shalt.err (!%p239_p9)
}
 0x10f   :  { %138 = dma.vmem_to_hbm [thread:$0]  %s136_s12, 128, %s326_s3, [#allocation4]  }
 0x110   :  { %247 = dma.done.wait [#allocation4], 128  }
 0x111   :  { %248 = vsyncadd [#allocation4], 4294967168 }
 0x112   :  { %142 = vsyncpa [#allocation3], 1 }
 0x113   :  { %143 = vsyncpa [#allocation6], 1 }
 0x114   :  { %144 = vsyncpa [#allocation4], 1 }

</bundles_post_ra>
